<compile_context>
chip_gen: v7x
topology: tpu7x:2x2x1
jax: 0.10.0
libtpu: 0.0.40
codegen_flags: <defaults>
</compile_context>

<pallas_src>
import jax
import jax.numpy as jnp
import numpy as np
from jax.experimental import pallas as pl
from jax.experimental.pallas import tpu as pltpu

KH = KW = 13   # nn.Conv2d(kernel_size=(13, 13), padding='same')
POOL = 2       # nn.MaxPool2d(kernel_size=(2, 2))


def conv_act_pool_kernel(x_ref, w_ref, b_ref, o_ref):
    # x_ref: (Hp, Wp*C_in)          bf16  'same'-padded image, W and C flattened (lane-dense)
    # w_ref: (KH, Wp*C_in, W*C_out) bf16  per-kh Toeplitz weights, cols ordered (parity, w//2, co)
    # b_ref: (1, W*C_out)           f32   bias replicated over the (parity, w//2) column blocks
    # o_ref: (Ho, Wo*C_out)         f32   pooled output, lane index = (w//2)*C_out + co
    Hp = x_ref.shape[0]
    H = Hp - (KH - 1)
    n_lanes = w_ref.shape[2]

    acc = jnp.zeros((H, n_lanes), dtype=jnp.float32)
    for kh in range(KH):                       # static unroll: KH matmuls, K = Wp*C_in, N = W*C_out
        acc = acc + jnp.dot(x_ref[kh:kh + H, :], w_ref[kh],
                            preferred_element_type=jnp.float32)

    acc = acc + b_ref[...]                     # bias
    acc = jnp.maximum(acc, 0.0)                # ReLU

    # MaxPool 2x2 (stride 2):
    #  - H: max over adjacent row pairs (one tiny sublane-split reshape of an 8 KiB tile)
    #  - W: columns are parity-split, so it is just a max of the two lane halves
    acc = jnp.max(acc.reshape(H // POOL, POOL, n_lanes), axis=1)
    half = n_lanes // 2
    o_ref[...] = jnp.maximum(acc[:, :half], acc[:, half:]).astype(o_ref.dtype)


def conv_act_pool(x_nchw, w_oihw, b):
    """Matches ConvActPool.forward: pool(relu(conv(x))) with NCHW in/out."""
    N, C_in, H, W = x_nchw.shape
    C_out = w_oihw.shape[0]
    # TODO(synk): odd H/W would need PyTorch-style floor pooling; guarded here.
    assert H % POOL == 0 and W % POOL == 0, "MaxPool2d(2,2) path assumes even H and W"

    pad = (KH - 1) // 2                        # 'same' pad for odd kernel, stride 1
    Hp, Wp = H + KH - 1, W + KW - 1
    Ho, Wo = H // POOL, W // POOL
    KD = Wp * C_in                             # contraction depth of each per-kh matmul
    ND = W * C_out                             # matmul output width (lane-dense)

    # --- input: NCHW -> padded NHWC -> lane-dense (N, Hp, Wp*C_in), bf16 matmul operand
    x = jnp.transpose(x_nchw, (0, 2, 3, 1))
    x = jnp.pad(x, ((0, 0), (pad, pad), (pad, pad), (0, 0)))
    x = x.reshape(N, Hp, KD).astype(jnp.bfloat16)

    # --- weights: OIHW -> HWIO -> per-kh Toeplitz matrices (KH, Wp*C_in, W*C_out).
    # One-time weight prep (would be pre-folded in a real model).  Output columns are
    # permuted to (w parity, w//2, c_out) so the kernel's 2-wide W-pool is a lane-half max.
    w_hwio = jnp.transpose(w_oihw, (2, 3, 1, 0))                       # (KH, KW, C_in, C_out)
    slabs = [jnp.pad(w_hwio, ((0, 0), (wo, Wp - KW - wo), (0, 0), (0, 0)))
             for wo in range(W)]                                       # each (KH, Wp, C_in, C_out)
    wt = jnp.stack(slabs, axis=3)                                      # (KH, Wp, C_in, W, C_out)
    order = np.concatenate([np.arange(0, W, 2), np.arange(1, W, 2)])   # even w first, then odd w
    wt = wt[:, :, :, order, :]
    wt = wt.reshape(KH, KD, ND).astype(jnp.bfloat16)

    b_row = jnp.tile(b, W).reshape(1, ND).astype(jnp.float32)          # bias depends only on c_out

    out = pl.pallas_call(
        conv_act_pool_kernel,
        out_shape=jax.ShapeDtypeStruct((N, Ho, Wo * C_out), x_nchw.dtype),
        grid_spec=pltpu.PrefetchScalarGridSpec(
            num_scalar_prefetch=0,
            grid=(N,),                                                 # one image per grid step
            in_specs=[
                pl.BlockSpec((None, Hp, KD), lambda n: (n, 0, 0)),     # padded image, squeezed batch
                pl.BlockSpec((KH, KD, ND), lambda n: (0, 0, 0)),       # Toeplitz weights, stay resident
                pl.BlockSpec((1, ND), lambda n: (0, 0)),               # bias row
            ],
            out_specs=pl.BlockSpec((None, Ho, Wo * C_out), lambda n: (n, 0, 0)),
        ),
        compiler_params=pltpu.CompilerParams(dimension_semantics=("parallel",)),
    )(x, wt, b_row)

    out = out.reshape(N, Ho, Wo, C_out)
    return jnp.transpose(out, (0, 3, 1, 2))                            # NHWC -> NCHW


def reference(x_nchw, w_oihw, b):
    """Pure-JAX reference mirroring the PyTorch module."""
    dn = jax.lax.conv_dimension_numbers(x_nchw.shape, w_oihw.shape,
                                        ("NCHW", "OIHW", "NCHW"))
    y = jax.lax.conv_general_dilated(x_nchw, w_oihw, window_strides=(1, 1),
                                     padding="SAME", dimension_numbers=dn)
    y = y + b.reshape(1, -1, 1, 1)
    y = jnp.maximum(y, 0.0)
    y = jax.lax.reduce_window(y, -jnp.inf, jax.lax.max,
                              window_dimensions=(1, 1, POOL, POOL),
                              window_strides=(1, 1, POOL, POOL),
                              padding="VALID")
    return y


if __name__ == "__main__":
    key = jax.random.PRNGKey(0)
    kx, kw, kb = jax.random.split(key, 3)

    N, C_in, H, W = 2, 4, 16, 16
    C_out = 8

    x = jax.random.normal(kx, (N, C_in, H, W), dtype=jnp.float32)
    # Deterministic Conv2d-style init (uniform in +/- 1/sqrt(fan_in)).
    fan_in = C_in * KH * KW
    bound = 1.0 / np.sqrt(fan_in)
    w = jax.random.uniform(kw, (C_out, C_in, KH, KW), dtype=jnp.float32,
                           minval=-bound, maxval=bound)
    b = jax.random.uniform(kb, (C_out,), dtype=jnp.float32,
                           minval=-bound, maxval=bound)

    out = conv_act_pool(x, w, b)
    out = jax.block_until_ready(out)

    assert out.shape == (N, C_out, H // POOL, W // POOL), out.shape
    ref = reference(x, w, b)
    # Tolerance accounts for bf16 matmul operands (f32 accumulation) per the perf review.
    np.testing.assert_allclose(np.asarray(out), np.asarray(ref), rtol=1e-2, atol=1e-2)

    print("KERNEL_OK")
</pallas_src>

<mosaic_0001>
module attributes {stable_mosaic.version = 11 : i64} {
  func.func @conv_act_pool_kernel(%arg0: i32, %arg1: memref<1x28x112xbf16, #tpu.memory_space<vmem>>, %arg2: memref<13x112x128xbf16, #tpu.memory_space<vmem>>, %arg3: memref<1x128xf32, #tpu.memory_space<vmem>>, %arg4: memref<1x8x64xf32, #tpu.memory_space<vmem>>) attributes {dimension_semantics = [#tpu.dimension_semantics<parallel>], iteration_bounds = array<i64: 2>, scalar_prefetch = 0 : i64, scratch_operands = 0 : i64, tpu.core_type = #tpu.core_type<tc>, window_params = [{transform_indices = @transform_0, window_bounds = array<i64: 1, 28, 112>}, {pipeline_mode = #tpu.pipeline_mode<synchronous>, transform_indices = @transform_1, window_bounds = array<i64: 13, 112, 128>}, {pipeline_mode = #tpu.pipeline_mode<synchronous>, transform_indices = @transform_2, window_bounds = array<i64: 1, 128>}, {transform_indices = @transform_3, window_bounds = array<i64: 1, 8, 64>}]} {
    %cst = arith.constant 0.000000e+00 : f32
    %0 = vector.broadcast %cst : f32 to vector<16x128xf32>
    %c0 = arith.constant 0 : index
    %c0_0 = arith.constant 0 : index
    %c0_1 = arith.constant 0 : index
    %1 = vector.load %arg1[%c0, %c0_0, %c0_1] : memref<1x28x112xbf16, #tpu.memory_space<vmem>>, vector<1x16x112xbf16>
    %2 = vector.shape_cast %1 : vector<1x16x112xbf16> to vector<16x112xbf16>
    %c0_2 = arith.constant 0 : index
    %c0_3 = arith.constant 0 : index
    %c0_4 = arith.constant 0 : index
    %3 = vector.load %arg2[%c0_2, %c0_3, %c0_4] : memref<13x112x128xbf16, #tpu.memory_space<vmem>>, vector<1x112x128xbf16>
    %4 = vector.shape_cast %3 : vector<1x112x128xbf16> to vector<112x128xbf16>
    %cst_5 = arith.constant dense<0.000000e+00> : vector<16x128xf32>
    %5 = tpu.matmul %2, %4, %cst_5 {dimension_numbers = #tpu.dot_dimension_numbers<[1], [0], [0], [1], [0, 0, 1, 1], [], []>} : vector<16x112xbf16>, vector<112x128xbf16>, vector<16x128xf32> -> vector<16x128xf32>
    %6 = arith.addf %0, %5 : vector<16x128xf32>
    %c0_6 = arith.constant 0 : index
    %c1 = arith.constant 1 : index
    %c0_7 = arith.constant 0 : index
    %7 = vector.load %arg1[%c0_6, %c1, %c0_7] : memref<1x28x112xbf16, #tpu.memory_space<vmem>>, vector<1x16x112xbf16>
    %8 = vector.shape_cast %7 : vector<1x16x112xbf16> to vector<16x112xbf16>
    %c1_8 = arith.constant 1 : index
    %c0_9 = arith.constant 0 : index
    %c0_10 = arith.constant 0 : index
    %9 = vector.load %arg2[%c1_8, %c0_9, %c0_10] : memref<13x112x128xbf16, #tpu.memory_space<vmem>>, vector<1x112x128xbf16>
    %10 = vector.shape_cast %9 : vector<1x112x128xbf16> to vector<112x128xbf16>
    %cst_11 = arith.constant dense<0.000000e+00> : vector<16x128xf32>
    %11 = tpu.matmul %8, %10, %cst_11 {dimension_numbers = #tpu.dot_dimension_numbers<[1], [0], [0], [1], [0, 0, 1, 1], [], []>} : vector<16x112xbf16>, vector<112x128xbf16>, vector<16x128xf32> -> vector<16x128xf32>
    %12 = arith.addf %6, %11 : vector<16x128xf32>
    %c0_12 = arith.constant 0 : index
    %c2 = arith.constant 2 : index
    %c0_13 = arith.constant 0 : index
    %13 = vector.load %arg1[%c0_12, %c2, %c0_13] : memref<1x28x112xbf16, #tpu.memory_space<vmem>>, vector<1x16x112xbf16>
    %14 = vector.shape_cast %13 : vector<1x16x112xbf16> to vector<16x112xbf16>
    %c2_14 = arith.constant 2 : index
    %c0_15 = arith.constant 0 : index
    %c0_16 = arith.constant 0 : index
    %15 = vector.load %arg2[%c2_14, %c0_15, %c0_16] : memref<13x112x128xbf16, #tpu.memory_space<vmem>>, vector<1x112x128xbf16>
    %16 = vector.shape_cast %15 : vector<1x112x128xbf16> to vector<112x128xbf16>
    %cst_17 = arith.constant dense<0.000000e+00> : vector<16x128xf32>
    %17 = tpu.matmul %14, %16, %cst_17 {dimension_numbers = #tpu.dot_dimension_numbers<[1], [0], [0], [1], [0, 0, 1, 1], [], []>} : vector<16x112xbf16>, vector<112x128xbf16>, vector<16x128xf32> -> vector<16x128xf32>
    %18 = arith.addf %12, %17 : vector<16x128xf32>
    %c0_18 = arith.constant 0 : index
    %c3 = arith.constant 3 : index
    %c0_19 = arith.constant 0 : index
    %19 = vector.load %arg1[%c0_18, %c3, %c0_19] : memref<1x28x112xbf16, #tpu.memory_space<vmem>>, vector<1x16x112xbf16>
    %20 = vector.shape_cast %19 : vector<1x16x112xbf16> to vector<16x112xbf16>
    %c3_20 = arith.constant 3 : index
    %c0_21 = arith.constant 0 : index
    %c0_22 = arith.constant 0 : index
    %21 = vector.load %arg2[%c3_20, %c0_21, %c0_22] : memref<13x112x128xbf16, #tpu.memory_space<vmem>>, vector<1x112x128xbf16>
    %22 = vector.shape_cast %21 : vector<1x112x128xbf16> to vector<112x128xbf16>
    %cst_23 = arith.constant dense<0.000000e+00> : vector<16x128xf32>
    %23 = tpu.matmul %20, %22, %cst_23 {dimension_numbers = #tpu.dot_dimension_numbers<[1], [0], [0], [1], [0, 0, 1, 1], [], []>} : vector<16x112xbf16>, vector<112x128xbf16>, vector<16x128xf32> -> vector<16x128xf32>
    %24 = arith.addf %18, %23 : vector<16x128xf32>
    %c0_24 = arith.constant 0 : index
    %c4 = arith.constant 4 : index
    %c0_25 = arith.constant 0 : index
    %25 = vector.load %arg1[%c0_24, %c4, %c0_25] : memref<1x28x112xbf16, #tpu.memory_space<vmem>>, vector<1x16x112xbf16>
    %26 = vector.shape_cast %25 : vector<1x16x112xbf16> to vector<16x112xbf16>
    %c4_26 = arith.constant 4 : index
    %c0_27 = arith.constant 0 : index
    %c0_28 = arith.constant 0 : index
    %27 = vector.load %arg2[%c4_26, %c0_27, %c0_28] : memref<13x112x128xbf16, #tpu.memory_space<vmem>>, vector<1x112x128xbf16>
    %28 = vector.shape_cast %27 : vector<1x112x128xbf16> to vector<112x128xbf16>
    %cst_29 = arith.constant dense<0.000000e+00> : vector<16x128xf32>
    %29 = tpu.matmul %26, %28, %cst_29 {dimension_numbers = #tpu.dot_dimension_numbers<[1], [0], [0], [1], [0, 0, 1, 1], [], []>} : vector<16x112xbf16>, vector<112x128xbf16>, vector<16x128xf32> -> vector<16x128xf32>
    %30 = arith.addf %24, %29 : vector<16x128xf32>
    %c0_30 = arith.constant 0 : index
    %c5 = arith.constant 5 : index
    %c0_31 = arith.constant 0 : index
    %31 = vector.load %arg1[%c0_30, %c5, %c0_31] : memref<1x28x112xbf16, #tpu.memory_space<vmem>>, vector<1x16x112xbf16>
    %32 = vector.shape_cast %31 : vector<1x16x112xbf16> to vector<16x112xbf16>
    %c5_32 = arith.constant 5 : index
    %c0_33 = arith.constant 0 : index
    %c0_34 = arith.constant 0 : index
    %33 = vector.load %arg2[%c5_32, %c0_33, %c0_34] : memref<13x112x128xbf16, #tpu.memory_space<vmem>>, vector<1x112x128xbf16>
    %34 = vector.shape_cast %33 : vector<1x112x128xbf16> to vector<112x128xbf16>
    %cst_35 = arith.constant dense<0.000000e+00> : vector<16x128xf32>
    %35 = tpu.matmul %32, %34, %cst_35 {dimension_numbers = #tpu.dot_dimension_numbers<[1], [0], [0], [1], [0, 0, 1, 1], [], []>} : vector<16x112xbf16>, vector<112x128xbf16>, vector<16x128xf32> -> vector<16x128xf32>
    %36 = arith.addf %30, %35 : vector<16x128xf32>
    %c0_36 = arith.constant 0 : index
    %c6 = arith.constant 6 : index
    %c0_37 = arith.constant 0 : index
    %37 = vector.load %arg1[%c0_36, %c6, %c0_37] : memref<1x28x112xbf16, #tpu.memory_space<vmem>>, vector<1x16x112xbf16>
    %38 = vector.shape_cast %37 : vector<1x16x112xbf16> to vector<16x112xbf16>
    %c6_38 = arith.constant 6 : index
    %c0_39 = arith.constant 0 : index
    %c0_40 = arith.constant 0 : index
    %39 = vector.load %arg2[%c6_38, %c0_39, %c0_40] : memref<13x112x128xbf16, #tpu.memory_space<vmem>>, vector<1x112x128xbf16>
    %40 = vector.shape_cast %39 : vector<1x112x128xbf16> to vector<112x128xbf16>
    %cst_41 = arith.constant dense<0.000000e+00> : vector<16x128xf32>
    %41 = tpu.matmul %38, %40, %cst_41 {dimension_numbers = #tpu.dot_dimension_numbers<[1], [0], [0], [1], [0, 0, 1, 1], [], []>} : vector<16x112xbf16>, vector<112x128xbf16>, vector<16x128xf32> -> vector<16x128xf32>
    %42 = arith.addf %36, %41 : vector<16x128xf32>
    %c0_42 = arith.constant 0 : index
    %c7 = arith.constant 7 : index
    %c0_43 = arith.constant 0 : index
    %43 = vector.load %arg1[%c0_42, %c7, %c0_43] : memref<1x28x112xbf16, #tpu.memory_space<vmem>>, vector<1x16x112xbf16>
    %44 = vector.shape_cast %43 : vector<1x16x112xbf16> to vector<16x112xbf16>
    %c7_44 = arith.constant 7 : index
    %c0_45 = arith.constant 0 : index
    %c0_46 = arith.constant 0 : index
    %45 = vector.load %arg2[%c7_44, %c0_45, %c0_46] : memref<13x112x128xbf16, #tpu.memory_space<vmem>>, vector<1x112x128xbf16>
    %46 = vector.shape_cast %45 : vector<1x112x128xbf16> to vector<112x128xbf16>
    %cst_47 = arith.constant dense<0.000000e+00> : vector<16x128xf32>
    %47 = tpu.matmul %44, %46, %cst_47 {dimension_numbers = #tpu.dot_dimension_numbers<[1], [0], [0], [1], [0, 0, 1, 1], [], []>} : vector<16x112xbf16>, vector<112x128xbf16>, vector<16x128xf32> -> vector<16x128xf32>
    %48 = arith.addf %42, %47 : vector<16x128xf32>
    %c0_48 = arith.constant 0 : index
    %c8 = arith.constant 8 : index
    %c0_49 = arith.constant 0 : index
    %49 = vector.load %arg1[%c0_48, %c8, %c0_49] : memref<1x28x112xbf16, #tpu.memory_space<vmem>>, vector<1x16x112xbf16>
    %50 = vector.shape_cast %49 : vector<1x16x112xbf16> to vector<16x112xbf16>
    %c8_50 = arith.constant 8 : index
    %c0_51 = arith.constant 0 : index
    %c0_52 = arith.constant 0 : index
    %51 = vector.load %arg2[%c8_50, %c0_51, %c0_52] : memref<13x112x128xbf16, #tpu.memory_space<vmem>>, vector<1x112x128xbf16>
    %52 = vector.shape_cast %51 : vector<1x112x128xbf16> to vector<112x128xbf16>
    %cst_53 = arith.constant dense<0.000000e+00> : vector<16x128xf32>
    %53 = tpu.matmul %50, %52, %cst_53 {dimension_numbers = #tpu.dot_dimension_numbers<[1], [0], [0], [1], [0, 0, 1, 1], [], []>} : vector<16x112xbf16>, vector<112x128xbf16>, vector<16x128xf32> -> vector<16x128xf32>
    %54 = arith.addf %48, %53 : vector<16x128xf32>
    %c0_54 = arith.constant 0 : index
    %c9 = arith.constant 9 : index
    %c0_55 = arith.constant 0 : index
    %55 = vector.load %arg1[%c0_54, %c9, %c0_55] : memref<1x28x112xbf16, #tpu.memory_space<vmem>>, vector<1x16x112xbf16>
    %56 = vector.shape_cast %55 : vector<1x16x112xbf16> to vector<16x112xbf16>
    %c9_56 = arith.constant 9 : index
    %c0_57 = arith.constant 0 : index
    %c0_58 = arith.constant 0 : index
    %57 = vector.load %arg2[%c9_56, %c0_57, %c0_58] : memref<13x112x128xbf16, #tpu.memory_space<vmem>>, vector<1x112x128xbf16>
    %58 = vector.shape_cast %57 : vector<1x112x128xbf16> to vector<112x128xbf16>
    %cst_59 = arith.constant dense<0.000000e+00> : vector<16x128xf32>
    %59 = tpu.matmul %56, %58, %cst_59 {dimension_numbers = #tpu.dot_dimension_numbers<[1], [0], [0], [1], [0, 0, 1, 1], [], []>} : vector<16x112xbf16>, vector<112x128xbf16>, vector<16x128xf32> -> vector<16x128xf32>
    %60 = arith.addf %54, %59 : vector<16x128xf32>
    %c0_60 = arith.constant 0 : index
    %c10 = arith.constant 10 : index
    %c0_61 = arith.constant 0 : index
    %61 = vector.load %arg1[%c0_60, %c10, %c0_61] : memref<1x28x112xbf16, #tpu.memory_space<vmem>>, vector<1x16x112xbf16>
    %62 = vector.shape_cast %61 : vector<1x16x112xbf16> to vector<16x112xbf16>
    %c10_62 = arith.constant 10 : index
    %c0_63 = arith.constant 0 : index
    %c0_64 = arith.constant 0 : index
    %63 = vector.load %arg2[%c10_62, %c0_63, %c0_64] : memref<13x112x128xbf16, #tpu.memory_space<vmem>>, vector<1x112x128xbf16>
    %64 = vector.shape_cast %63 : vector<1x112x128xbf16> to vector<112x128xbf16>
    %cst_65 = arith.constant dense<0.000000e+00> : vector<16x128xf32>
    %65 = tpu.matmul %62, %64, %cst_65 {dimension_numbers = #tpu.dot_dimension_numbers<[1], [0], [0], [1], [0, 0, 1, 1], [], []>} : vector<16x112xbf16>, vector<112x128xbf16>, vector<16x128xf32> -> vector<16x128xf32>
    %66 = arith.addf %60, %65 : vector<16x128xf32>
    %c0_66 = arith.constant 0 : index
    %c11 = arith.constant 11 : index
    %c0_67 = arith.constant 0 : index
    %67 = vector.load %arg1[%c0_66, %c11, %c0_67] : memref<1x28x112xbf16, #tpu.memory_space<vmem>>, vector<1x16x112xbf16>
    %68 = vector.shape_cast %67 : vector<1x16x112xbf16> to vector<16x112xbf16>
    %c11_68 = arith.constant 11 : index
    %c0_69 = arith.constant 0 : index
    %c0_70 = arith.constant 0 : index
    %69 = vector.load %arg2[%c11_68, %c0_69, %c0_70] : memref<13x112x128xbf16, #tpu.memory_space<vmem>>, vector<1x112x128xbf16>
    %70 = vector.shape_cast %69 : vector<1x112x128xbf16> to vector<112x128xbf16>
    %cst_71 = arith.constant dense<0.000000e+00> : vector<16x128xf32>
    %71 = tpu.matmul %68, %70, %cst_71 {dimension_numbers = #tpu.dot_dimension_numbers<[1], [0], [0], [1], [0, 0, 1, 1], [], []>} : vector<16x112xbf16>, vector<112x128xbf16>, vector<16x128xf32> -> vector<16x128xf32>
    %72 = arith.addf %66, %71 : vector<16x128xf32>
    %c0_72 = arith.constant 0 : index
    %c12 = arith.constant 12 : index
    %c0_73 = arith.constant 0 : index
    %73 = vector.load %arg1[%c0_72, %c12, %c0_73] : memref<1x28x112xbf16, #tpu.memory_space<vmem>>, vector<1x16x112xbf16>
    %74 = vector.shape_cast %73 : vector<1x16x112xbf16> to vector<16x112xbf16>
    %c12_74 = arith.constant 12 : index
    %c0_75 = arith.constant 0 : index
    %c0_76 = arith.constant 0 : index
    %75 = vector.load %arg2[%c12_74, %c0_75, %c0_76] : memref<13x112x128xbf16, #tpu.memory_space<vmem>>, vector<1x112x128xbf16>
    %76 = vector.shape_cast %75 : vector<1x112x128xbf16> to vector<112x128xbf16>
    %cst_77 = arith.constant dense<0.000000e+00> : vector<16x128xf32>
    %77 = tpu.matmul %74, %76, %cst_77 {dimension_numbers = #tpu.dot_dimension_numbers<[1], [0], [0], [1], [0, 0, 1, 1], [], []>} : vector<16x112xbf16>, vector<112x128xbf16>, vector<16x128xf32> -> vector<16x128xf32>
    %78 = arith.addf %72, %77 : vector<16x128xf32>
    %c0_78 = arith.constant 0 : index
    %c0_79 = arith.constant 0 : index
    %79 = vector.load %arg3[%c0_78, %c0_79] : memref<1x128xf32, #tpu.memory_space<vmem>>, vector<1x128xf32>
    %80 = vector.broadcast %79 : vector<1x128xf32> to vector<16x128xf32>
    %81 = arith.addf %78, %80 : vector<16x128xf32>
    %cst_80 = arith.constant 0.000000e+00 : f32
    %82 = vector.broadcast %cst_80 : f32 to vector<16x128xf32>
    %83 = arith.maximumf %81, %82 : vector<16x128xf32>
    %84 = vector.shape_cast %83 : vector<16x128xf32> to vector<8x2x128xf32>
    %cst_81 = arith.constant dense<0xFF800000> : vector<8x128xf32>
    %85 = vector.multi_reduction <maximumf>, %84, %cst_81 [1] : vector<8x2x128xf32> to vector<8x128xf32>
    %86 = vector.extract_strided_slice %85 {offsets = [0, 0], sizes = [8, 64], strides = [1, 1]} : vector<8x128xf32> to vector<8x64xf32>
    %87 = vector.extract_strided_slice %85 {offsets = [0, 64], sizes = [8, 64], strides = [1, 1]} : vector<8x128xf32> to vector<8x64xf32>
    %88 = arith.maximumf %86, %87 : vector<8x64xf32>
    %c0_82 = arith.constant 0 : index
    %c0_83 = arith.constant 0 : index
    %c0_84 = arith.constant 0 : index
    %89 = vector.load %arg4[%c0_82, %c0_83, %c0_84] : memref<1x8x64xf32, #tpu.memory_space<vmem>>, vector<1x8x64xf32>
    %90 = vector.shape_cast %89 : vector<1x8x64xf32> to vector<8x64xf32>
    %91 = vector.shape_cast %88 : vector<8x64xf32> to vector<1x8x64xf32>
    tpu.vector_store %arg4[%c0_82, %c0_83, %c0_84], %91 {strides = array<i32>} : memref<1x8x64xf32, #tpu.memory_space<vmem>>, vector<1x8x64xf32>,
    return
  }
  func.func @transform_0(%arg0: i32) -> (i32, i32, i32) {
    %c0_i32 = arith.constant 0 : i32
    %c0_i32_0 = arith.constant 0 : i32
    %c0_i32_1 = arith.constant 0 : i32
    return %arg0, %c0_i32, %c0_i32_0 : i32, i32, i32
  }
  func.func @transform_1(%arg0: i32) -> (i32, i32, i32) {
    %c0_i32 = arith.constant 0 : i32
    %c0_i32_0 = arith.constant 0 : i32
    %c0_i32_1 = arith.constant 0 : i32
    %c0_i32_2 = arith.constant 0 : i32
    return %c0_i32, %c0_i32_0, %c0_i32_1 : i32, i32, i32
  }
  func.func @transform_2(%arg0: i32) -> (i32, i32) {
    %c0_i32 = arith.constant 0 : i32
    %c0_i32_0 = arith.constant 0 : i32
    %c0_i32_1 = arith.constant 0 : i32
    return %c0_i32, %c0_i32_0 : i32, i32
  }
  func.func @transform_3(%arg0: i32) -> (i32, i32, i32) {
    %c0_i32 = arith.constant 0 : i32
    %c0_i32_0 = arith.constant 0 : i32
    %c0_i32_1 = arith.constant 0 : i32
    return %arg0, %c0_i32, %c0_i32_0 : i32, i32, i32
  }
}

</mosaic_0001>

<bundles_post_ra>
// kernel: tpu_custom_call.1
= control target key start
LH: loop header
LB: loop body
LE: loop exit
PB: predicated region body
PF: predicated region fallthrough
CT: control target
= control target key end

     0   :  { %8 = vsyncpa [#allocation3], 0  ;;  %s3065_s0 = inlined_call_operand.vmem [shape: bf16[2,28,112], index: 0, kind: input, shape index: {}]   ;;  %s3066_s1 = inlined_call_operand.hbm [shape: bf16[13,112,128], index: 1, kind: input, shape index: {}]   ;;  %s3067_s2 = inlined_call_operand.vmem [shape: f32[1,128], index: 2, kind: input, shape index: {}]   ;;  %s3068_s3 = inlined_call_operand.hbm [shape: f32[2,8,64], index: 3, kind: output, shape index: {}]  }
   0x1   :  { %9 = vsyncpa [#allocation4], 0 }
   0x2   :  { %11 = vsyncpa [#allocation4 + $0x1], 0  ;;  %s2717_s12 = smov 0   ;;  %s2719_s13 = smov 0  }
   0x3   :  { %s2721_s14 = smov 0   ;;  %s2723_s15 = smov 0  }
   0x4 LB: > { %s2738_s16 = sadd.s32 4294967295, %s2687_s15   ;;  %s1961_s17 = sadd.s32 4294967294, %s2687_s15   ;;  %s2687_s15 = sphi %s2723_s15, %s3084_s15   ;;  %s2683_s14 = sphi %s2721_s14, %s3083_s14   ;;  %s2679_s13 = sphi %s2719_s13, %s3082_s13   ;;  %s2675_s12 = sphi %s2717_s12, %s3081_s12  }
   0x5   : > { %s2742_s18 = sadd.s32 1, %s2687_s15   ;;  %s92_s19 = sadd.s32 1, %s2683_s14 }
   0x6   : > { %s89_s20 = ssub.s32 %s2687_s15, %s2742_s18  ;;  %p102_p0 = scmp.ne.s32.totalorder %s2683_s14, %s2679_s13 }
   0x7   : > { %p90_p1 = scmp.eq.s32.totalorder %s89_s20, 0  ;;  %p103_p2 = scmp.eq.s32.totalorder %s2738_s16, 1 }
   0x8   : > { %p108_p3 = scmp.ne.s32.totalorder %s2679_s13, %s2675_s12  ;;  %p109_p4 = scmp.eq.s32.totalorder %s1961_s17, 1 }
   0x9   : > { %s2753_s21 = scalar_select %p90_p1, %s2683_s14, %s92_s19  }
   0xa   : > { %p2755_p5 = por %p103_p2, %p102_p0  ;;  %p2759_p6 = por %p109_p4, %p108_p3 }
   0xb   : > { %p1962_p7 = scmp.ge.s32.totalorder %s2687_s15, 1  ;;  %p116_p8 = scmp.lt.s32.totalorder %s2687_s15, 3 }
   0xc   : > { %s3072_s22 = scalar_select %p2755_p5, 1, 0 }
   0xd   : > { %s3073_s23 = scalar_select %p2759_p6, 1, 0 }
   0xe   : > { %p3069_p9 = scmp.eq.s32.totalorder %s2738_s16, 0  ;;  %p2766_p10 = pnand %p1962_p7, %p116_p8 }
   0xf   : > { %s2689_s25 = smov [#allocation2]   ;;  %s2593_s30 = scalar_lea.hbm %s3066_s1, 11648 }
  0x10   : > { %s3074_s24 = scalar_select %p2766_p10, 1, 0 }
  0x11   : > { %s128_s26 = sshll.u32 %s2689_s25, 4  ;;  %p2438_p11 = pneg %p2766_p10  ;;  %s129_s26 = int_to_ptr.vmem [resolvable:$true] %s128_s26 }
  0x12   : > { %p2594_p13 = scmp.ne.s32.totalorder %s3066_s1, %s2593_s30  ;;  %p2600_p3 = scmp.lt.u32.totalorder %s2593_s30, %s3066_s1 }
  0x13   : > { %p2774_p12 = pnand %p3069_p9, %p2438_p11 }
  0x15   : > { %p2595_p0 = pneg %p2774_p12 }
  0x17   : > { %p2596_p1 = pnand %p2595_p0, %p2594_p13 }
  0x19   : > { %p2597_p2 = pneg %p2596_p1 }
  0x1b   : > { %p2602_p4 = pnand %p2600_p3, %p2597_p2 }
  0x1d   : > { %2605 = shalt.err (!%p2602_p4)
}
  0x1e   : > { %s2606_s8 = scalar_lea.vmem %s129_s26, 11648  ;;  %p2614_p9 = scmp.lt.s32.totalorder %s129_s26, %s129_s26 }
  0x1f   : > { %p2607_p7 = scmp.ne.s32.totalorder %s129_s26, %s2606_s8  ;;  %p2615_p6 = scmp.lt.s32.totalorder %s2606_s8, %s2606_s8 }
  0x21   : > { %p2609_p8 = pnand %p2607_p7, %p2595_p0  ;;  %p2616_p5 = por %p2615_p6, %p2614_p9 }
  0x23   : > { %p2610_p11 = pneg %p2609_p8 }
  0x25   : > { %p2617_p10 = pnand %p2616_p5, %p2610_p11 }
  0x27   : > { %2620 = shalt.err (!%p2617_p10)
}
  0x28   : > { %s2690_s9 = smov 64   ;;  %s2691_s10 = smov 4  }
  0x29   : > { %2441 = dma.hbm_to_vmem [thread:$0]  (!%p2774_p12), %s3066_s1, 11648, %s129_s26, [#allocation3], %s2690_s9, %s2690_s9, %s2691_s10  }
  0x2a   : > { %p3076_p13 = scmp.ne.s32.totalorder %s3074_s24, 0 }
  0x2b   : > { %p3077_p1 = scmp.eq.s32.totalorder (!%p3076_p13), %s2738_s16, 0 }
  0x2c   : > { %155 = sbr.rel (%p3076_p13) target bundleno = 633 (0x279), region = 32 }
  0x33   : > { %2666 = dma.done.wait (%p3077_p1), [#allocation3], 11648   ;;  %p3078_p0 = pmov %p3077_p1 }
  0x34   : > { %v2692_v0 = vmov 0.0   ;;  %vm2693_vm0 = vmmov 0   ;;  %v2488_v1 = vld [vmem:[#allocation2 + $0x38] sm:$0xff]   ;;  %p179_p5 = scmp.lt.s32.totalorder %s2738_s16, 1  ;;  %v2489_v2 = vld [vmem:[#allocation2] sm:$0xff]   ;;  %v2491_v4 = vld [vmem:[#allocation2 + $0x8] sm:$0xff]  }
  0x35   : > { %2668 = vsyncadd (%p3078_p0), [#allocation3], 4294955648  ;;  %2198 = vmatprep.subr.bf16.mxu0 %v2692_v0  ;;  %2216 = vmatprep.subr.bf16.mxu1 %v2692_v0  ;;  %v2490_v3 = vld [vmem:[#allocation2 + $0x40] sm:$0xff]   ;;  %v2492_v5 = vld [vmem:[#allocation2 + $0x48] sm:$0xff]   ;;  %vm225_vm1 = vsmask.f32 7424 }
  0x36   : > { %2212 = vmatprep.mubr.msk.bf16.mxu0 %vm2693_vm0, %v2692_v0  ;;  %2230 = vmatprep.mubr.msk.bf16.mxu1 %vm2693_vm0, %v2692_v0  ;;  %s180_s19 = scalar_select %p179_p5, %s2738_s16, 1  ;;  %v2493_v6 = vld [vmem:[#allocation2 + $0x10] sm:$0xff]   ;;  %v2495_v8 = vld [vmem:[#allocation2 + $0x18] sm:$0xff]   ;;  %v2497_v12 = vld [vmem:[#allocation2 + $0x20] sm:$0xff]   ;;  %vm280_vm2 = vcmask 916480   ;;  %vm429_vm3 = vcmask 1046528  }
  0x37   : > { %2199 = vmatpush3.bf16.msra.mxu0 %v2488_v1  ;;  %2217 = vmatpush3.bf16.msra.mxu1 %v2489_v2  ;;  %v2494_v7 = vld [vmem:[#allocation2 + $0x50] sm:$0xff]   ;;  %v2496_v9 = vld [vmem:[#allocation2 + $0x58] sm:$0xff]   ;;  %v2498_v15 = vld [vmem:[#allocation2 + $0x60] sm:$0xff]   ;;  %vm540_vm4 = vsmask.f32 6400  ;;  %vm665_vm5 = vcmask 1045504  }
  0x38   : > { %2200 = vmatprep.subr.bf16.mxu0 %v2692_v0  ;;  %2218 = vmatprep.subr.bf16.mxu1 %v2692_v0  ;;  %s2093_s20 = sshll.u32 %s180_s19, 4  ;;  %v2499_v19 = vld [vmem:[#allocation2 + $0x28] sm:$0xff]   ;;  %v2501_v24 = vld [vmem:[#allocation2 + $0x30] sm:$0xff]   ;;  %v2506_v28 = vld [vmem:[#allocation2 + $0x78] sm:$0xff]   ;;  %vm776_vm6 = vsmask.f32 5376 }
  0x39   : > { %s2816_s26 = scalar_lea.vmem %s3065_s0, %s2093_s20  ;;  %v2500_v21 = vld [vmem:[#allocation2 + $0x68] sm:$0xff]   ;;  %v2504_v26 = vld [vmem:[#allocation2 + $0x70] sm:$0xff]   ;;  %v2508_v30 = vld [vmem:[#allocation2 + $0x80] sm:$0xff]   ;;  %vm901_vm7 = vcmask 1044480   ;;  %vm1012_vm8 = vsmask.f32 4352 }
  0x3a   : > { %v185_v10 = vld [vmem:[%s2816_s26] sm:$0xf]  ;;  %v2821_v11 = vld [vmem:[%s2816_s26 + $0x4] sm:$0xf]  ;;  %v2505_v27 = vld [vmem:[#allocation2 + $0xa8] sm:$0xff]   ;;  %vm1747_vm9 = vcmask 1041408  }
  0x3b   : > { %2201 = vmatpush3.bf16.msra.mxu0 %v2490_v3  ;;  %2219 = vmatpush3.bf16.msra.mxu1 %v2491_v4  ;;  %v1970_v13 = vcombine.low %v185_v10, %v2821_v11  ;;  %v2826_v14 = vld [vmem:[%s2816_s26 + $0x8] ss:$0 sps:$4 sm:$0x11]   ;;  %v2507_v29 = vld [vmem:[#allocation2 + $0xb0] sm:$0xff]   ;;  %v2509_v31 = vld [vmem:[#allocation2 + $0xb8] sm:$0xff]   ;;  %s2695_s29 = smov 64  }
  0x3c   : > { %2202 = vmatprep.subr.bf16.mxu0 %v2692_v0  ;;  %2220 = vmatprep.subr.bf16.mxu1 %v2692_v0  ;;  %v234_v18 = vshll.u32 %v2826_v14, 16  ;;  %v410_v32 = vld [vmem:[%s2816_s26] sm:$0xe]  ;;  %v2849_v33 = vld [vmem:[%s2816_s26 + $0x8] ss:$0 sps:$4 sm:$0x33]  }
  0x3d   : > { %v229_v16 = vshll.u32 %v1970_v13, 16  ;;  %v227_v17 = vshrl.u32 %v1970_v13, 16  ;;  %v2510_v34 = vld [vmem:[#allocation2 + $0x88] sm:$0xff]   ;;  %v1988_v35 = vcombine.low %v410_v32, %v2821_v11  ;;  %v2511_v36 = vld [vmem:[#allocation2 + $0xc0] sm:$0xff]   ;;  %v2512_v37 = vld [vmem:[#allocation2 + $0x90] sm:$0xff]   ;;  %v550_v41 = vshrl.u32 %v2849_v33, 16 }
  0x3e   : > { %v236_v23 = vrot.slane %v234_v18, 1  ;;  %v2513_v38 = vld [vmem:[#allocation2 + $0xc8] sm:$0xff]   ;;  %v553_v42 = vshll.u32 %v2849_v33, 16  ;;  %v2514_v43 = vld [vmem:[#allocation2 + $0x98] sm:$0xff]   ;;  %v2515_v44 = vld [vmem:[#allocation2 + $0xd0] sm:$0xff]   ;;  %v431_v49 = vrot.slane %v2826_v14, 1 }
  0x3f   : > { %2203 = vmatpush3.bf16.msra.mxu0 %v2492_v5  ;;  %2221 = vmatpush3.bf16.msra.mxu1 %v2493_v6  ;;  %v231_v20 = vrot.slane %v229_v16, 1  ;;  %v542_v39 = vshrl.u32 %v1988_v35, 16  ;;  %v545_v40 = vshll.u32 %v1988_v35, 16  ;;  %v552_v47 = vrot.slane %v550_v41, 1  ;;  %v2516_v50 = vld [vmem:[#allocation2 + $0xa0] sm:$0xff]   ;;  %v2517_v52 = vld [vmem:[#allocation2 + $0xd8] sm:$0xff]  }
  0x40   : > { %2204 = vmatprep.subr.bf16.mxu0 %v2692_v0  ;;  %2222 = vmatprep.subr.bf16.mxu1 %v2692_v0  ;;  %v555_v48 = vrot.slane %v553_v42, 2  ;;  %v430_v51 = vrot.slane %v1988_v35, 1  ;;  %v2519_v56 = vld [vmem:[#allocation2 + $0xe0] sm:$0xff]   ;;  %v2521_v58 = vld [vmem:[#allocation2 + $0x118] sm:$0xff]   ;;  %v2522_v59 = vld [vmem:[#allocation2 + $0xe8] sm:$0xff]   ;;  %vm1853_vm10 = vcmask 1041409  }
  0x41   : > { %v232_v22 = vor.u32 %v231_v20, %v227_v17  ;;  %v544_v45 = vrot.slane %v542_v39, 1  ;;  %v547_v46 = vrot.slane %v545_v40, 2  ;;  %v2523_v60 = vld [vmem:[#allocation2 + $0x120] sm:$0xff]   ;;  %v2524_v61 = vld [vmem:[#allocation2 + $0xf0] sm:$0xff]   ;;  %v2525_v62 = vld [vmem:[#allocation2 + $0x128] sm:$0xff]   ;;  %v667_v20 = vrot.slane %v2849_v33, 2 }
  0x42   : > { %v556_v54 = vor.u32 %v555_v48, %v552_v47  ;;  %v432_v55 = vsel %vm429_vm3, %v430_v51, %v431_v49  ;;  %v646_v63 = vld [vmem:[%s2816_s26] sm:$0xc]  ;;  %v2526_v1 = vld [vmem:[#allocation2 + $0xf8] sm:$0xff]   ;;  %v2880_v3 = vld [vmem:[%s2816_s26 + $0x8] ss:$0 sps:$4 sm:$0x77]  }
  0x43   : > { %2205 = vmatpush3.bf16.msra.mxu0 %v2494_v7  ;;  %2223 = vmatpush3.bf16.msra.mxu1 %v2495_v8  ;;  %v237_v25 = vsel %vm225_vm1, %v232_v22, %v236_v23  ;;  %v548_v53 = vor.u32 %v547_v46, %v544_v45  ;;  %v2006_v2 = vcombine.low %v646_v63, %v2821_v11  ;;  %v2527_v4 = vld [vmem:[#allocation2 + $0x130] sm:$0xff]   ;;  %v2528_v5 = vld [vmem:[#allocation2 + $0x100] sm:$0xff]   ;;  %v2529_v6 = vld [vmem:[#allocation2 + $0x138] sm:$0xff]   ;;  %v789_v10 = vshll.u32 %v2880_v3, 16  ;;  %s176_s30 = sand.u32 1, %s2679_s13   ;;  %s2090_s5 = sshll.u32 %s2738_s16, 7 }
  0x44   : > { %2206 = vmatprep.subr.bf16.mxu0 %v2692_v0  ;;  %2224 = vmatprep.subr.bf16.mxu1 %v2692_v0  ;;  %v2532_v18 = vld [vmem:[#allocation2 + $0x110] sm:$0xff]   ;;  %v882_v32 = vld [vmem:[%s2816_s26] sm:$0x8]  ;;  %v2907_v33 = vld [vmem:[%s2816_s26 + $0x8] sm:$0xf]  ;;  %vm1856_vm11 = vcmask 1042434   ;;  %s3021_s10 = scalar_lea.hbm %s3068_s3, %s2090_s5 }
  0x45   : > { %v557_v57 = vsel %vm540_vm4, %v548_v53, %v556_v54  ;;  %v778_v7 = vshrl.u32 %v2006_v2, 16  ;;  %v781_v8 = vshll.u32 %v2006_v2, 16  ;;  %v791_v17 = vrot.slane %v789_v10, 3  ;;  %v2545_v39 = vld [vmem:[#allocation2 + $0x1a8] sm:$0xff]   ;;  %v2547_v45 = vld [vmem:[#allocation2 + $0x1b0] sm:$0xff]   ;;  %v2549_v53 = vld [vmem:[#allocation2 + $0x1b8] sm:$0xff]  }
  0x46   : > { %v2024_v35 = vcombine.low %v882_v32, %v2821_v11  ;;  %v2557_v63 = vld [vmem:[#allocation2 + $0x208] sm:$0xff]   ;;  %v2577_v32 = vld [vmem:[#allocation2 + $0x250] sm:$0xff]   ;;  %s3014_s4 = sshll.u32 %s176_s30, 3  ;;  %vm1859_vm12 = vcmask 1043459   ;;  %vm1862_vm13 = vcmask 1044484   ;;  %vm1865_vm14 = vcmask 1045509  }
  0x47   : > { %2207 = vmatpush3.bf16.msra.mxu0 %v2496_v9  ;;  %2225 = vmatpush3.bf16.msra.mxu1 %v2497_v12  ;;  %v786_v9 = vshrl.u32 %v2880_v3, 16  ;;  %v2530_v12 = vld [vmem:[#allocation2 + $0x108] sm:$0xff]   ;;  %v780_v14 = vrot.slane %v778_v7, 2  ;;  %v2561_v7 = vld [vmem:[#allocation2 + $0x218] sm:$0xff]   ;;  %vm1868_vm15 = vcmask 1046534   ;;  %s178_s6 = scalar_lea.vmem [#allocation5], %s3014_s4 }
  0x48   : > { %2208 = vmatprep.subr.bf16.mxu0 %v2692_v0  ;;  %2226 = vmatprep.subr.bf16.mxu1 %v2692_v0  ;;  %v1014_v40 = vshrl.u32 %v2024_v35, 16  ;;  %v1017_v41 = vshll.u32 %v2024_v35, 16  ;;  %v902_v51 = vrot.slane %v2024_v35, 3  ;;  %v2562_v10 = vld [vmem:[#allocation2 + $0x1e8] sm:$0xff]   ;;  %s1890_s7 = sshll.u32 %s178_s6, 4  ;;  %s1877_s16 = scalar_lea.sflag [#allocation4], %s176_s30  ;;  %s3023_s7 = int_to_ptr.vmem [resolvable:$true] %s1890_s7 }
  0x49   : > { %v788_v16 = vrot.slane %v786_v9, 2  ;;  %s2621_s11 = scalar_lea.vmem %s3023_s7, 128  ;;  %p3079_p9 = scmp.ne.s32.totalorder %s3072_s22, 0 }
  0x4a   : > { %v1016_v46 = vrot.slane %v1014_v40, 3  ;;  %v1019_v47 = vrot.slane %v1017_v41, 4  ;;  %p2622_p6 = scmp.ne.s32.totalorder %s3023_s7, %s2621_s11  ;;  %s2696_s17 = smov [#allocation5]  }
  0x4b   : > { %2209 = vmatpush3.bf16.msra.mxu0 %v2498_v15  ;;  %2227 = vmatpush3.bf16.msra.mxu1 %v2499_v19  ;;  %v783_v15 = vrot.slane %v781_v8, 3  ;;  %v666_v19 = vrot.slane %v2006_v2, 2  ;;  %v792_v23 = vor.u32 %v791_v17, %v788_v16  ;;  %v2936_v2 = vld [vmem:[%s2816_s26 + $0x8] sm:$0xf]  ;;  %v2564_v16 = vld [vmem:[#allocation2 + $0x1f0] sm:$0xff]   ;;  %s2625_s19 = sshll.u32 %s2696_s17, 4  ;;  %s2626_s19 = int_to_ptr.vmem [resolvable:$false] %s2625_s19 }
  0x4c   : > { %2210 = vmatprep.subr.bf16.mxu0 %v2692_v0  ;;  %2228 = vmatprep.subr.bf16.mxu1 %v2692_v0  ;;  %v1020_v54 = vor.u32 %v1019_v47, %v1016_v46  ;;  %v2943_v8 = vld [vmem:[%s2816_s26 + $0xc] ss:$0 sps:$4 sm:$0x11]   ;;  %v2582_v47 = vld [vmem:[#allocation2 + $0x298] sm:$0xff]   ;;  %p2623_p10 = pnand %p2622_p6, %p3079_p9  ;;  %s2627_s20 = scalar_lea.vmem %s2626_s19, 256 }
  0x4d   : > { %v784_v22 = vor.u32 %v783_v15, %v780_v14  ;;  %v1256_v15 = vshll.u32 %v2943_v8, 16  ;;  %v2565_v17 = vld [vmem:[#allocation2 + $0x228] sm:$0xff]   ;;  %v1368_v46 = vrot.slane %v2943_v8, 1  ;;  %p2628_p2 = scmp.lt.s32.totalorder %s3023_s7, %s2626_s19  ;;  %p2629_p3 = scmp.lt.s32.totalorder %s2627_s20, %s2621_s11 }
  0x4e   : > { %p2624_p12 = pneg %p2623_p10 }
  0x4f   : > { %2211 = vmatpush3.bf16.msra.mxu0 %v2500_v21  ;;  %2229 = vmatpush3.bf16.msra.mxu1 %v2501_v24  ;;  %v2533_v21 = vld [vmem:[#allocation2 + $0x148] sm:$0xff]   ;;  %v668_v24 = vsel %vm665_vm5, %v666_v19, %v667_v20  ;;  %v1258_v19 = vrot.slane %v1256_v15, 1  ;;  %v2042_v20 = vcombine.low %v2821_v11, %v2907_v33  ;;  %v2572_v11 = vld [vmem:[#allocation2 + $0x270] sm:$0xff]   ;;  %p2630_p4 = por %p2629_p3, %p2628_p2 }
  0x50   : > { %2234 = vmatprep.subr.bf16.mxu0 %v2692_v0  ;;  %2252 = vmatprep.subr.bf16.mxu1 %v2692_v0 }
  0x51   : > { %p2631_p7 = pnand %p2630_p4, %p2624_p12 }
  0x52   : > { %2213 = vmatmul.mubr.msk.bf16.vlgmr.msra.gmra.mrb[0].mxu0 %vm280_vm2, %v237_v25  ;;  %2231 = vmatmul.mubr.msk.bf16.vlgmr.msra.gmra.mrb[0].mxu1 %vm280_vm2, %v1970_v13  ;;  %v2531_v13 = vld [vmem:[#allocation2 + $0x140] sm:$0xff]   ;;  %v2535_v25 = vld [vmem:[#allocation2 + $0x150] sm:$0xff]  }
  0x53   : > { %2235 = vmatpush3.bf16.msra.mxu0 %v2504_v26  ;;  %2253 = vmatpush3.bf16.msra.mxu1 %v2505_v27  ;;  %v793_v26 = vsel %vm776_vm6, %v784_v22, %v792_v23  ;;  %v2537_v27 = vld [vmem:[#allocation2 + $0x188] sm:$0xff]  }
  0x54   : > { %2236 = vmatprep.subr.bf16.mxu0 %v2692_v0  ;;  %2254 = vmatprep.subr.bf16.mxu1 %v2692_v0  ;;  %v2570_v23 = vld [vmem:[#allocation2 + $0x268] sm:$0xff]  }
  0x55   : > { %2248 = vmatprep.mubr.msk.bf16.mxu0 %vm2693_vm0, %v2692_v0  ;;  %2266 = vmatprep.mubr.msk.bf16.mxu1 %vm2693_vm0, %v2692_v0 }
  0x57   : > { %2237 = vmatpush3.bf16.msra.mxu0 %v2506_v28  ;;  %2255 = vmatpush3.bf16.msra.mxu1 %v2507_v29  ;;  %v2538_v28 = vld [vmem:[#allocation2 + $0x158] sm:$0xff]   ;;  %v2539_v29 = vld [vmem:[#allocation2 + $0x190] sm:$0xff]  }
  0x58   : > { %2238 = vmatprep.subr.bf16.mxu0 %v2692_v0  ;;  %2256 = vmatprep.subr.bf16.mxu1 %v2692_v0 }
  0x5b   : > { %2239 = vmatpush3.bf16.msra.mxu0 %v2508_v30  ;;  %2257 = vmatpush3.bf16.msra.mxu1 %v2509_v31  ;;  %v2540_v30 = vld [vmem:[#allocation2 + $0x160] sm:$0xff]   ;;  %v2541_v31 = vld [vmem:[#allocation2 + $0x198] sm:$0xff]  }
  0x5c   : > { %2240 = vmatprep.subr.bf16.mxu0 %v2692_v0  ;;  %2258 = vmatprep.subr.bf16.mxu1 %v2692_v0 }
  0x5f   : > { %2241 = vmatpush3.bf16.msra.mxu0 %v2510_v34  ;;  %2259 = vmatpush3.bf16.msra.mxu1 %v2511_v36  ;;  %v2542_v34 = vld [vmem:[#allocation2 + $0x168] sm:$0xff]   ;;  %v2033_v36 = vcombine.low %v2907_v33, %v2907_v33 }
  0x60   : > { %2242 = vmatprep.subr.bf16.mxu0 %v2692_v0  ;;  %2260 = vmatprep.subr.bf16.mxu1 %v2692_v0  ;;  %v2578_v33 = vld [vmem:[#allocation2 + $0x288] sm:$0xff]  }
  0x61   : > { %v1022_v42 = vshrl.u32 %v2033_v36, 16 }
  0x63   : > { %2243 = vmatpush3.bf16.msra.mxu0 %v2512_v37  ;;  %2261 = vmatpush3.bf16.msra.mxu1 %v2513_v38  ;;  %v2543_v37 = vld [vmem:[#allocation2 + $0x1a0] sm:$0xff]   ;;  %v2544_v38 = vld [vmem:[#allocation2 + $0x170] sm:$0xff]   ;;  %v1024_v48 = vrot.slane %v1022_v42, 3 }
  0x64   : > { %2244 = vmatprep.subr.bf16.mxu0 %v2692_v0  ;;  %2262 = vmatprep.subr.bf16.mxu1 %v2692_v0 }
  0x67   : > { %2245 = vmatpush3.bf16.msra.mxu0 %v2514_v43  ;;  %2263 = vmatpush3.bf16.msra.mxu1 %v2515_v44  ;;  %v1025_v43 = vshll.u32 %v2033_v36, 16  ;;  %v2546_v44 = vld [vmem:[#allocation2 + $0x178] sm:$0xff]  }
  0x68   : > { %2246 = vmatprep.subr.bf16.mxu0 %v2692_v0  ;;  %2264 = vmatprep.subr.bf16.mxu1 %v2692_v0 }
  0x69   : > { %v1027_v49 = vrot.slane %v1025_v43, 4 }
  0x6b   : > { %2247 = vmatpush3.bf16.msra.mxu0 %v2516_v50  ;;  %2265 = vmatpush3.bf16.msra.mxu1 %v2517_v52  ;;  %v2548_v50 = vld [vmem:[#allocation2 + $0x180] sm:$0xff]   ;;  %v903_v52 = vrot.slane %v2880_v3, 3  ;;  %v2558_v3 = vld [vmem:[#allocation2 + $0x1d8] sm:$0xff]  }
  0x6c   : > { %2270 = vmatprep.subr.bf16.mxu0 %v2692_v0  ;;  %2288 = vmatprep.subr.bf16.mxu1 %v2692_v0 }
  0x6e   : > { %2249 = vmatmul.mubr.msk.bf16.vlgmr.msra.gmra.mrb[4].mxu0 %vm280_vm2, %v432_v55  ;;  %2267 = vmatmul.mubr.msk.bf16.vlgmr.msra.gmra.mrb[4].mxu1 %vm280_vm2, %v557_v57  ;;  %v1028_v55 = vor.u32 %v1027_v49, %v1024_v48  ;;  %v2551_v57 = vld [vmem:[#allocation2 + $0x1c0] sm:$0xff]  }
  0x6f   : > { %2271 = vmatpush3.bf16.msra.mxu0 %v2519_v56  ;;  %2289 = vmatpush3.bf16.msra.mxu1 %v2521_v58  ;;  %v904_v56 = vsel %vm901_vm7, %v902_v51, %v903_v52  ;;  %v2584_v51 = vld [vmem:[#allocation2 + $0x2a0] sm:$0xff]  }
  0x70   : > { %2272 = vmatprep.subr.bf16.mxu0 %v2692_v0  ;;  %2290 = vmatprep.subr.bf16.mxu1 %v2692_v0  ;;  %v1029_v58 = vsel %vm1012_vm8, %v1020_v54, %v1028_v55  ;;  %v2587_v54 = vld [vmem:[#allocation2 + $0x2b0] sm:$0xff]   ;;  %v2588_v55 = vld [vmem:[#allocation2 + $0x2b8] sm:$0xff]  }
  0x71   : > { %2284 = vmatprep.mubr.msk.bf16.mxu0 %vm2693_vm0, %v2692_v0  ;;  %2302 = vmatprep.mubr.msk.bf16.mxu1 %vm2693_vm0, %v2692_v0 }
  0x73   : > { %2273 = vmatpush3.bf16.msra.mxu0 %v2522_v59  ;;  %2291 = vmatpush3.bf16.msra.mxu1 %v2523_v60  ;;  %v2553_v59 = vld [vmem:[#allocation2 + $0x1f8] sm:$0xff]   ;;  %v2554_v60 = vld [vmem:[#allocation2 + $0x1c8] sm:$0xff]  }
  0x74   : > { %2274 = vmatprep.subr.bf16.mxu0 %v2692_v0  ;;  %2292 = vmatprep.subr.bf16.mxu1 %v2692_v0 }
  0x77   : > { %2275 = vmatpush3.bf16.msra.mxu0 %v2524_v61  ;;  %2293 = vmatpush3.bf16.msra.mxu1 %v2525_v62  ;;  %v2555_v61 = vld [vmem:[#allocation2 + $0x200] sm:$0xff]   ;;  %v2556_v62 = vld [vmem:[#allocation2 + $0x1d0] sm:$0xff]  }
  0x78   : > { %2276 = vmatprep.subr.bf16.mxu0 %v2692_v0  ;;  %2294 = vmatprep.subr.bf16.mxu1 %v2692_v0 }
  0x7b   : > { %2277 = vmatpush3.bf16.msra.mxu0 %v2526_v1  ;;  %2295 = vmatpush3.bf16.msra.mxu1 %v2527_v4  ;;  %v1222_v1 = vld [vmem:[%s2816_s26 + $0x4] sm:$0xf]  ;;  %v2559_v4 = vld [vmem:[#allocation2 + $0x210] sm:$0xff]  }
  0x7c   : > { %2278 = vmatprep.subr.bf16.mxu0 %v2692_v0  ;;  %2296 = vmatprep.subr.bf16.mxu1 %v2692_v0 }
  0x7f   : > { %2279 = vmatpush3.bf16.msra.mxu0 %v2528_v5  ;;  %2297 = vmatpush3.bf16.msra.mxu1 %v2529_v6  ;;  %v2051_v5 = vcombine.low %v1222_v1, %v2936_v2  ;;  %v2560_v6 = vld [vmem:[#allocation2 + $0x1e0] sm:$0xff]  }
  0x80   : > { %2280 = vmatprep.subr.bf16.mxu0 %v2692_v0  ;;  %2298 = vmatprep.subr.bf16.mxu1 %v2692_v0 }
  0x81   : > { %v1251_v9 = vshll.u32 %v2051_v5, 16 }
  0x83   : > { %2281 = vmatpush3.bf16.msra.mxu0 %v2530_v12  ;;  %2299 = vmatpush3.bf16.msra.mxu1 %v2531_v13  ;;  %v2563_v12 = vld [vmem:[#allocation2 + $0x220] sm:$0xff]   ;;  %v1249_v13 = vshrl.u32 %v2051_v5, 16  ;;  %v1253_v14 = vrot.slane %v1251_v9, 1 }
  0x84   : > { %2282 = vmatprep.subr.bf16.mxu0 %v2692_v0  ;;  %2300 = vmatprep.subr.bf16.mxu1 %v2692_v0 }
  0x87   : > { %2283 = vmatpush3.bf16.msra.mxu0 %v2532_v18  ;;  %2301 = vmatpush3.bf16.msra.mxu1 %v2533_v21  ;;  %v1254_v18 = vor.u32 %v1253_v14, %v1249_v13  ;;  %v2567_v21 = vld [vmem:[#allocation2 + $0x230] sm:$0xff]  }
  0x88   : > { %2306 = vmatprep.subr.bf16.mxu0 %v2692_v0  ;;  %2324 = vmatprep.subr.bf16.mxu1 %v2692_v0 }
  0x89   : > { %v1259_v22 = vsel %vm225_vm1, %v1254_v18, %v1258_v19  ;;  %vm1874_vm1 = vcmask 523264  }
  0x8a   : > { %2285 = vmatmul.mubr.msk.bf16.vlgmr.msra.gmra.mrb[8].mxu0 %vm280_vm2, %v668_v24  ;;  %2303 = vmatmul.mubr.msk.bf16.vlgmr.msra.gmra.mrb[8].mxu1 %vm280_vm2, %v793_v26  ;;  %v2571_v24 = vld [vmem:[#allocation2 + $0x238] sm:$0xff]  }
  0x8b   : > { %2307 = vmatpush3.bf16.msra.mxu0 %v2535_v25  ;;  %2325 = vmatpush3.bf16.msra.mxu1 %v2537_v27  ;;  %v2573_v25 = vld [vmem:[#allocation2 + $0x240] sm:$0xff]   ;;  %v2574_v26 = vld [vmem:[#allocation2 + $0x278] sm:$0xff]  }
  0x8c   : > { %2308 = vmatprep.subr.bf16.mxu0 %v2692_v0  ;;  %2326 = vmatprep.subr.bf16.mxu1 %v2692_v0  ;;  %v1348_v27 = vld [vmem:[%s2816_s26 + $0x4] sm:$0xe] }
  0x8d   : > { %2320 = vmatprep.mubr.msk.bf16.mxu0 %vm2693_vm0, %v2692_v0  ;;  %2338 = vmatprep.mubr.msk.bf16.mxu1 %vm2693_vm0, %v2692_v0 }
  0x8f   : > { %2309 = vmatpush3.bf16.msra.mxu0 %v2538_v28  ;;  %2327 = vmatpush3.bf16.msra.mxu1 %v2539_v29  ;;  %v2575_v28 = vld [vmem:[#allocation2 + $0x248] sm:$0xff]   ;;  %v2576_v29 = vld [vmem:[#allocation2 + $0x280] sm:$0xff]  }
  0x90   : > { %2310 = vmatprep.subr.bf16.mxu0 %v2692_v0  ;;  %2328 = vmatprep.subr.bf16.mxu1 %v2692_v0 }
  0x93   : > { %2311 = vmatpush3.bf16.msra.mxu0 %v2540_v30  ;;  %2329 = vmatpush3.bf16.msra.mxu1 %v2541_v31  ;;  %v2061_v30 = vcombine.low %v1348_v27, %v2936_v2  ;;  %v2970_v31 = vld [vmem:[%s2816_s26 + $0xc] ss:$0 sps:$4 sm:$0x33]  }
  0x94   : > { %2312 = vmatprep.subr.bf16.mxu0 %v2692_v0  ;;  %2330 = vmatprep.subr.bf16.mxu1 %v2692_v0  ;;  %v1486_v36 = vshrl.u32 %v2970_v31, 16 }
  0x95   : > { %v1481_v35 = vshll.u32 %v2061_v30, 16 }
  0x96   : > { %v1488_v42 = vrot.slane %v1486_v36, 1 }
  0x97   : > { %2313 = vmatpush3.bf16.msra.mxu0 %v2542_v34  ;;  %2331 = vmatpush3.bf16.msra.mxu1 %v2543_v37  ;;  %v1478_v34 = vshrl.u32 %v2061_v30, 16  ;;  %v1489_v37 = vshll.u32 %v2970_v31, 16  ;;  %v1483_v41 = vrot.slane %v1481_v35, 2 }
  0x98   : > { %2314 = vmatprep.subr.bf16.mxu0 %v2692_v0  ;;  %2332 = vmatprep.subr.bf16.mxu1 %v2692_v0 }
  0x99   : > { %v1480_v40 = vrot.slane %v1478_v34, 1  ;;  %v1491_v43 = vrot.slane %v1489_v37, 2 }
  0x9b   : > { %2315 = vmatpush3.bf16.msra.mxu0 %v2544_v38  ;;  %2333 = vmatpush3.bf16.msra.mxu1 %v2545_v39  ;;  %v2579_v38 = vld [vmem:[#allocation2 + $0x258] sm:$0xff]   ;;  %v2580_v39 = vld [vmem:[#allocation2 + $0x290] sm:$0xff]   ;;  %v1484_v48 = vor.u32 %v1483_v41, %v1480_v40  ;;  %v1492_v49 = vor.u32 %v1491_v43, %v1488_v42 }
  0x9c   : > { %2316 = vmatprep.subr.bf16.mxu0 %v2692_v0  ;;  %2334 = vmatprep.subr.bf16.mxu1 %v2692_v0 }
  0x9d   : > { %v1493_v52 = vsel %vm540_vm4, %v1484_v48, %v1492_v49 }
  0x9f   : > { %2317 = vmatpush3.bf16.msra.mxu0 %v2546_v44  ;;  %2335 = vmatpush3.bf16.msra.mxu1 %v2547_v45  ;;  %v2581_v44 = vld [vmem:[#allocation2 + $0x260] sm:$0xff]   ;;  %v1367_v45 = vrot.slane %v2061_v30, 1 }
  0xa0   : > { %2318 = vmatprep.subr.bf16.mxu0 %v2692_v0  ;;  %2336 = vmatprep.subr.bf16.mxu1 %v2692_v0 }
  0xa3   : > { %2319 = vmatpush3.bf16.msra.mxu0 %v2548_v50  ;;  %2337 = vmatpush3.bf16.msra.mxu1 %v2549_v53  ;;  %v1369_v50 = vsel %vm429_vm3, %v1367_v45, %v1368_v46  ;;  %v2586_v53 = vld [vmem:[#allocation2 + $0x2a8] sm:$0xff]  }
  0xa4   : > { %2342 = vmatprep.subr.bf16.mxu0 %v2692_v0  ;;  %2360 = vmatprep.subr.bf16.mxu1 %v2692_v0 }
  0xa6   : > { %2321 = vmatmul.mubr.msk.bf16.vlgmr.msra.gmra.mrb[12].mxu0 %vm280_vm2, %v904_v56  ;;  %2339 = vmatmul.mubr.msk.bf16.vlgmr.msra.gmra.mrb[12].mxu1 %vm280_vm2, %v1029_v58  ;;  %v2589_v56 = vld [vmem:[#allocation2 + $0x2c0] sm:$0xff]   ;;  %v2590_v58 = vld [vmem:[#allocation2 + $0x2c8] sm:$0xff]  }
  0xa7   : > { %2343 = vmatpush3.bf16.msra.mxu0 %v2551_v57  ;;  %2361 = vmatpush3.bf16.msra.mxu1 %v2553_v59  ;;  %v1582_v57 = vld [vmem:[%s2816_s26 + $0x4] sm:$0xc] }
  0xa8   : > { %2344 = vmatprep.subr.bf16.mxu0 %v2692_v0  ;;  %2362 = vmatprep.subr.bf16.mxu1 %v2692_v0  ;;  %v2079_v59 = vcombine.low %v1582_v57, %v2936_v2 }
  0xa9   : > { %2356 = vmatprep.mubr.msk.bf16.mxu0 %vm2693_vm0, %v2692_v0  ;;  %2374 = vmatprep.mubr.msk.bf16.mxu1 %vm2693_vm0, %v2692_v0 }
  0xab   : > { %2345 = vmatpush3.bf16.msra.mxu0 %v2554_v60  ;;  %2363 = vmatpush3.bf16.msra.mxu1 %v2555_v61  ;;  %v2591_v60 = vld [vmem:[#allocation2 + $0x2d0] sm:$0xff]   ;;  %v1601_v61 = vrot.slane %v2079_v59, 2 }
  0xac   : > { %2346 = vmatprep.subr.bf16.mxu0 %v2692_v0  ;;  %2364 = vmatprep.subr.bf16.mxu1 %v2692_v0 }
  0xaf   : > { %2347 = vmatpush3.bf16.msra.mxu0 %v2556_v62  ;;  %2365 = vmatpush3.bf16.msra.mxu1 %v2557_v63  ;;  %v1602_v62 = vrot.slane %v2970_v31, 2 }
  0xb0   : > { %2348 = vmatprep.subr.bf16.mxu0 %v2692_v0  ;;  %2366 = vmatprep.subr.bf16.mxu1 %v2692_v0 }
  0xb1   : > { %v1603_v63 = vsel %vm665_vm5, %v1601_v61, %v1602_v62 }
  0xb3   : > { %2349 = vmatpush3.bf16.msra.mxu0 %v2558_v3  ;;  %2367 = vmatpush3.bf16.msra.mxu1 %v2559_v4 }
  0xb4   : > { %2350 = vmatprep.subr.bf16.mxu0 %v2692_v0  ;;  %2368 = vmatprep.subr.bf16.mxu1 %v2692_v0 }
  0xb7   : > { %2351 = vmatpush3.bf16.msra.mxu0 %v2560_v6  ;;  %2369 = vmatpush3.bf16.msra.mxu1 %v2561_v7 }
  0xb8   : > { %2352 = vmatprep.subr.bf16.mxu0 %v2692_v0  ;;  %2370 = vmatprep.subr.bf16.mxu1 %v2692_v0 }
  0xbb   : > { %2353 = vmatpush3.bf16.msra.mxu0 %v2562_v10  ;;  %2371 = vmatpush3.bf16.msra.mxu1 %v2563_v12 }
  0xbc   : > { %2354 = vmatprep.subr.bf16.mxu0 %v2692_v0  ;;  %2372 = vmatprep.subr.bf16.mxu1 %v2692_v0 }
  0xbf   : > { %2355 = vmatpush3.bf16.msra.mxu0 %v2564_v16  ;;  %2373 = vmatpush3.bf16.msra.mxu1 %v2565_v17 }
  0xc0   : > { %2378 = vmatprep.subr.bf16.mxu0 %v2692_v0  ;;  %2396 = vmatprep.subr.bf16.mxu1 %v2692_v0 }
  0xc2   : > { %2357 = vmatmul.mubr.msk.bf16.vlgmr.msra.gmra.mrb[16].mxu0 %vm280_vm2, %v2042_v20  ;;  %2375 = vmatmul.mubr.msk.bf16.vlgmr.msra.gmra.mrb[16].mxu1 %vm280_vm2, %v1259_v22 }
  0xc3   : > { %2379 = vmatpush3.bf16.msra.mxu0 %v2567_v21  ;;  %2397 = vmatpush3.bf16.msra.mxu1 %v2570_v23 }
  0xc4   : > { %2380 = vmatprep.subr.bf16.mxu0 %v2692_v0  ;;  %2398 = vmatprep.subr.bf16.mxu1 %v2692_v0 }
  0xc5   : > { %2392 = vmatprep.mubr.msk.bf16.mxu0 %vm2693_vm0, %v2692_v0  ;;  %2410 = vmatprep.mubr.msk.bf16.mxu1 %vm2693_vm0, %v2692_v0 }
  0xc7   : > { %2381 = vmatpush3.bf16.msra.mxu0 %v2571_v24  ;;  %2399 = vmatpush3.bf16.msra.mxu1 %v2572_v11 }
  0xc8   : > { %2382 = vmatprep.subr.bf16.mxu0 %v2692_v0  ;;  %2400 = vmatprep.subr.bf16.mxu1 %v2692_v0 }
  0xcb   : > { %2383 = vmatpush3.bf16.msra.mxu0 %v2573_v25  ;;  %2401 = vmatpush3.bf16.msra.mxu1 %v2574_v26 }
  0xcc   : > { %2384 = vmatprep.subr.bf16.mxu0 %v2692_v0  ;;  %2402 = vmatprep.subr.bf16.mxu1 %v2692_v0 }
  0xcf   : > { %2385 = vmatpush3.bf16.msra.mxu0 %v2575_v28  ;;  %2403 = vmatpush3.bf16.msra.mxu1 %v2576_v29 }
  0xd0   : > { %2386 = vmatprep.subr.bf16.mxu0 %v2692_v0  ;;  %2404 = vmatprep.subr.bf16.mxu1 %v2692_v0 }
  0xd3   : > { %2387 = vmatpush3.bf16.msra.mxu0 %v2577_v32  ;;  %2405 = vmatpush3.bf16.msra.mxu1 %v2578_v33 }
  0xd4   : > { %2388 = vmatprep.subr.bf16.mxu0 %v2692_v0  ;;  %2406 = vmatprep.subr.bf16.mxu1 %v2692_v0 }
  0xd7   : > { %2389 = vmatpush3.bf16.msra.mxu0 %v2579_v38  ;;  %2407 = vmatpush3.bf16.msra.mxu1 %v2580_v39 }
  0xd8   : > { %2390 = vmatprep.subr.bf16.mxu0 %v2692_v0  ;;  %2408 = vmatprep.subr.bf16.mxu1 %v2692_v0 }
  0xdb   : > { %2391 = vmatpush3.bf16.msra.mxu0 %v2581_v44  ;;  %2409 = vmatpush3.bf16.msra.mxu1 %v2582_v47 }
  0xdc   : > { %2414 = vmatprep.subr.bf16.mxu0 %v2692_v0 }
  0xde   : > { %2393 = vmatmul.mubr.msk.bf16.vlgmr.msra.gmra.mrb[20].mxu0 %vm280_vm2, %v1369_v50  ;;  %2411 = vmatmul.mubr.msk.bf16.vlgmr.msra.gmra.mrb[20].mxu1 %vm280_vm2, %v1493_v52 }
  0xdf   : > { %2415 = vmatpush3.bf16.msra.mxu0 %v2584_v51  ;;  %2428 = vmatprep.mubr.msk.bf16.mxu0 %vm2693_vm0, %v2692_v0  ;;  %vm1871_vm0 = vcmask 1047559  }
  0xe0   : > { %2416 = vmatprep.subr.bf16.mxu0 %v2692_v0 }
  0xe3   : > { %2417 = vmatpush3.bf16.msra.mxu0 %v2586_v53 }
  0xe4   : > { %2418 = vmatprep.subr.bf16.mxu0 %v2692_v0 }
  0xe7   : > { %2419 = vmatpush3.bf16.msra.mxu0 %v2587_v54 }
  0xe8   : > { %2420 = vmatprep.subr.bf16.mxu0 %v2692_v0 }
  0xeb   : > { %2421 = vmatpush3.bf16.msra.mxu0 %v2588_v55 }
  0xec   : > { %2422 = vmatprep.subr.bf16.mxu0 %v2692_v0 }
  0xef   : > { %2423 = vmatpush3.bf16.msra.mxu0 %v2589_v56 }
  0xf0   : > { %2424 = vmatprep.subr.bf16.mxu0 %v2692_v0 }
  0xf3   : > { %2425 = vmatpush3.bf16.msra.mxu0 %v2590_v58 }
  0xf4   : > { %2426 = vmatprep.subr.bf16.mxu0 %v2692_v0 }
  0xf7   : > { %2427 = vmatpush3.bf16.msra.mxu0 %v2591_v60 }
  0xfa   : > { %2429 = vmatmul.mubr.msk.bf16.vlgmr.msra.gmra.mrb[24].mxu0 %vm280_vm2, %v1603_v63 }
 0x125   : > { %v318_v1 = vpop.f32.mrb[0].mxu0  ;;  %v403_v3 = vpop.f32.mrb[0].mxu1 }
 0x126   : > { %v2214_v4 = vpop.f32.mrb[1].mxu0  ;;  %v404_v5 = vadd.f32 %v403_v3, %v318_v1  ;;  %v2232_v6 = vpop.f32.mrb[1].mxu1 }
 0x127   : > { %v321_v2 = vpop.f32.mrb[2].mxu0  ;;  %v406_v7 = vpop.f32.mrb[2].mxu1 }
 0x128   : > { %v2215_v8 = vpop.f32.mrb[3].mxu0  ;;  %v407_v9 = vadd.f32 %v406_v7, %v321_v2  ;;  %v2233_v10 = vpop.f32.mrb[3].mxu1  ;;  %v2694_v7 = vmov 1983009808  }
 0x129   : > { %v1707_v8 = vunpack.c.l.s4 %v2694_v7 }
 0x12b   : > { %v1708_v10 = vunpack.c.0.s8 %v1707_v8 }
 0x141   : > { %v512_v12 = vpop.f32.mrb[4].mxu0  ;;  %v637_v15 = vpop.f32.mrb[4].mxu1 }
 0x142   : > { %v519_v13 = vadd.f32 %v512_v12, %v404_v5  ;;  %v2250_v14 = vpop.f32.mrb[5].mxu0  ;;  %v2268_v16 = vpop.f32.mrb[5].mxu1 }
 0x143   : > { %v515_v0 = vpop.f32.mrb[6].mxu0  ;;  %v640_v20 = vpop.f32.mrb[6].mxu1  ;;  %v2088_v14 = vld [vmem:[%s3067_s2] ss:$0 sm:$0xff] }
 0x144   : > { %v520_v17 = vadd.f32 %v515_v0, %v407_v9  ;;  %v644_v18 = vadd.f32 %v637_v15, %v519_v13  ;;  %v2251_v19 = vpop.f32.mrb[7].mxu0  ;;  %v2269_v21 = vpop.f32.mrb[7].mxu1  ;;  %v1709_v9 = vlaneseq }
 0x146   : > { %v645_v22 = vadd.f32 %v640_v20, %v520_v17  ;;  %v1710_v12 = vshrl.u32 %v1709_v9, 7 }
 0x15d   : > { %v748_v23 = vpop.f32.mrb[8].mxu0  ;;  %v873_v25 = vpop.f32.mrb[8].mxu1 }
 0x15e   : > { %v755_v24 = vadd.f32 %v748_v23, %v644_v18  ;;  %v2286_v11 = vpop.f32.mrb[9].mxu0  ;;  %v2304_v27 = vpop.f32.mrb[9].mxu1  ;;  %v1711_v18 = vsub.s32 %v1708_v10, %v1710_v12 }
 0x15f   : > { %v751_v26 = vpop.f32.mrb[10].mxu0  ;;  %v876_v31 = vpop.f32.mrb[10].mxu1 }
 0x160   : > { %v756_v28 = vadd.f32 %v751_v26, %v645_v22  ;;  %v880_v29 = vadd.f32 %v873_v25, %v755_v24  ;;  %v2287_v30 = vpop.f32.mrb[11].mxu0  ;;  %v2305_v32 = vpop.f32.mrb[11].mxu1 }
 0x162   : > { %v881_v33 = vadd.f32 %v876_v31, %v756_v28 }
 0x179   : > { %v984_v34 = vpop.f32.mrb[12].mxu0  ;;  %v1109_v37 = vpop.f32.mrb[12].mxu1 }
 0x17a   : > { %v991_v35 = vadd.f32 %v984_v34, %v880_v29  ;;  %v2322_v36 = vpop.f32.mrb[13].mxu0  ;;  %v2340_v39 = vpop.f32.mrb[13].mxu1 }
 0x17b   : > { %v987_v38 = vpop.f32.mrb[14].mxu0  ;;  %v1112_v43 = vpop.f32.mrb[14].mxu1 }
 0x17c   : > { %v992_v40 = vadd.f32 %v987_v38, %v881_v33  ;;  %v1116_v41 = vadd.f32 %v1109_v37, %v991_v35  ;;  %v2323_v42 = vpop.f32.mrb[15].mxu0  ;;  %v2341_v44 = vpop.f32.mrb[15].mxu1 }
 0x17e   : > { %v1117_v45 = vadd.f32 %v1112_v43, %v992_v40 }
 0x195   : > { %v1213_v46 = vpop.f32.mrb[16].mxu0  ;;  %v1339_v49 = vpop.f32.mrb[16].mxu1 }
 0x196   : > { %v1220_v47 = vadd.f32 %v1213_v46, %v1116_v41  ;;  %v2358_v48 = vpop.f32.mrb[17].mxu0  ;;  %v2376_v51 = vpop.f32.mrb[17].mxu1 }
 0x197   : > { %v1216_v50 = vpop.f32.mrb[18].mxu0  ;;  %v1342_v55 = vpop.f32.mrb[18].mxu1 }
 0x198   : > { %v1221_v52 = vadd.f32 %v1216_v50, %v1117_v45  ;;  %v1346_v53 = vadd.f32 %v1339_v49, %v1220_v47  ;;  %v2359_v54 = vpop.f32.mrb[19].mxu0  ;;  %v2377_v56 = vpop.f32.mrb[19].mxu1 }
 0x19a   : > { %v1347_v57 = vadd.f32 %v1342_v55, %v1221_v52 }
 0x1b1   : > { %v1449_v58 = vpop.f32.mrb[20].mxu0  ;;  %v1573_v61 = vpop.f32.mrb[20].mxu1 }
 0x1b2   : > { %v1456_v59 = vadd.f32 %v1449_v58, %v1346_v53  ;;  %v2394_v60 = vpop.f32.mrb[21].mxu0  ;;  %v2412_v63 = vpop.f32.mrb[21].mxu1 }
 0x1b3   : > { %v1452_v62 = vpop.f32.mrb[22].mxu0  ;;  %v1576_v5 = vpop.f32.mrb[22].mxu1 }
 0x1b4   : > { %v1457_v1 = vadd.f32 %v1452_v62, %v1347_v57  ;;  %v1580_v3 = vadd.f32 %v1573_v61, %v1456_v59  ;;  %v2395_v4 = vpop.f32.mrb[23].mxu0  ;;  %v2413_v6 = vpop.f32.mrb[23].mxu1 }
 0x1b6   : > { %v1581_v2 = vadd.f32 %v1576_v5, %v1457_v1 }
 0x1cd   : > { %v1683_v13 = vpop.f32.mrb[24].mxu0 }
 0x1ce   : > { %v1690_v15 = vadd.f32 %v1683_v13, %v1580_v3  ;;  %v2430_v0 = vpop.f32.mrb[25].mxu0 }
 0x1cf   : > { %v1686_v16 = vpop.f32.mrb[26].mxu0 }
 0x1d0   : > { %v1699_v17 = vadd.f32 %v2088_v14, %v1690_v15  ;;  %v1691_v19 = vadd.f32 %v1686_v16, %v1581_v2  ;;  %v2431_v20 = vpop.f32.mrb[27].mxu0 }
 0x1d2   : > { %v1701_v21 = vmax.f32 %v1699_v17, 0.0  ;;  %v1700_v22 = vadd.f32 %v2088_v14, %v1691_v19 }
 0x1d4   : > { %v1705_v23 = vcombine.high %v1701_v21, %v1701_v21  ;;  %v1712_v24 = vrot.slane %v1701_v21, %v1711_v18  ;;  %v1702_v11 = vmax.f32 %v1700_v22, 0.0 }
 0x1d6   : > { %v1719_v25 = vrot.slane %v1705_v23, %v1711_v18  ;;  %v1720_v26 = vcombine.high %v1712_v24, %v1712_v24  ;;  %v1722_v27 = vcombine.high %v1702_v11, %v1702_v11  ;;  %v1729_v28 = vrot.slane %v1702_v11, %v1711_v18 }
 0x1d7   : > { %v1748_v29 = vsel %vm1747_vm9, %v1712_v24, -inf }
 0x1d8   : > { %v1721_v30 = vcombine.high %v1719_v25, %v1719_v25  ;;  %v1736_v31 = vrot.slane %v1722_v27, %v1711_v18  ;;  %v1737_v32 = vcombine.high %v1729_v28, %v1729_v28  ;;  %v1776_v33 = vsel %vm1747_vm9, %v1729_v28, -inf }
 0x1d9   : > { %v1777_v34 = vrot.slane %v1776_v33, 4  ;;  %v1749_v35 = vrot.slane %v1748_v29, 4  ;;  %v1755_v36 = vsel %vm1747_vm9, %v1720_v26, -inf  ;;  %v1762_v37 = vsel %vm1747_vm9, %v1719_v25, -inf }
 0x1da   : > { %v1738_v38 = vcombine.high %v1736_v31, %v1736_v31  ;;  %v1756_v39 = vrot.slane %v1755_v36, 4  ;;  %v1769_v40 = vsel %vm1747_vm9, %v1721_v30, -inf  ;;  %v1763_v41 = vrot.slane %v1762_v37, 4 }
 0x1db   : > { %v1750_v42 = vmax.f32 %v1748_v29, %v1749_v35  ;;  %v1770_v43 = vrot.slane %v1769_v40, 4  ;;  %v1783_v44 = vsel %vm1747_vm9, %v1737_v32, -inf  ;;  %v1778_v45 = vmax.f32 %v1776_v33, %v1777_v34 }
 0x1dc   : > { %v1757_v46 = vmax.f32 %v1755_v36, %v1756_v39  ;;  %v1764_v47 = vmax.f32 %v1762_v37, %v1763_v41  ;;  %v1784_v48 = vrot.slane %v1783_v44, 4  ;;  %v1797_v49 = vsel %vm1747_vm9, %v1738_v38, -inf }
 0x1dd   : > { %v1751_v50 = vrot.slane %v1750_v42, 2  ;;  %v1771_v51 = vmax.f32 %v1769_v40, %v1770_v43  ;;  %v1798_v52 = vrot.slane %v1797_v49, 4  ;;  %v1790_v56 = vsel %vm1747_vm9, %v1736_v31, -inf }
 0x1de   : > { %v1758_v53 = vrot.slane %v1757_v46, 2  ;;  %v1765_v54 = vrot.slane %v1764_v47, 2  ;;  %v1785_v55 = vmax.f32 %v1783_v44, %v1784_v48  ;;  %v1779_v59 = vrot.slane %v1778_v45, 2 }
 0x1df   : > { %v1752_v57 = vmax.f32 %v1750_v42, %v1751_v50  ;;  %v1772_v58 = vrot.slane %v1771_v51, 2  ;;  %v1799_v60 = vmax.f32 %v1797_v49, %v1798_v52  ;;  %v1791_v1 = vrot.slane %v1790_v56, 4 }
 0x1e0   : > { %v1759_v61 = vmax.f32 %v1757_v46, %v1758_v53  ;;  %v1766_v62 = vmax.f32 %v1764_v47, %v1765_v54  ;;  %v1786_v63 = vrot.slane %v1785_v55, 2  ;;  %v1780_v13 = vmax.f32 %v1778_v45, %v1779_v59 }
 0x1e1   : > { %v1753_v3 = vrot.slane %v1752_v57, 1  ;;  %v1773_v4 = vmax.f32 %v1771_v51, %v1772_v58  ;;  %v1792_v6 = vmax.f32 %v1790_v56, %v1791_v1  ;;  %v1800_v9 = vrot.slane %v1799_v60, 2 }
 0x1e2   : > { %v1760_v5 = vrot.slane %v1759_v61, 1  ;;  %v1787_v8 = vmax.f32 %v1785_v55, %v1786_v63  ;;  %v1767_v12 = vrot.slane %v1766_v62, 1  ;;  %v1781_v18 = vrot.slane %v1780_v13, 1 }
 0x1e3   : > { %v1754_v2 = vmax.f32 %v1752_v57, %v1753_v3  ;;  %v1774_v7 = vrot.slane %v1773_v4, 1  ;;  %v1793_v14 = vrot.slane %v1792_v6, 2  ;;  %v1801_v16 = vmax.f32 %v1799_v60, %v1800_v9 }
 0x1e4   : > { %v1761_v10 = vmax.f32 %v1759_v61, %v1760_v5  ;;  %v1788_v0 = vrot.slane %v1787_v8, 1  ;;  %v1768_v17 = vmax.f32 %v1766_v62, %v1767_v12  ;;  %v1782_v22 = vmax.f32 %v1780_v13, %v1781_v18 }
 0x1e5   : > { %1812 = vrot.lane.b32.xlu1 %v1754_v2, %s2695_s29  ;;  %v1775_v15 = vmax.f32 %v1773_v4, %v1774_v7  ;;  %v1794_v19 = vmax.f32 %v1792_v6, %v1793_v14  ;;  %v1802_v21 = vrot.slane %v1801_v16, 1 }
 0x1e6   : > { %1814 = vrot.lane.b32.xlu0 %v1761_v10, %s2695_s29  ;;  %v1789_v20 = vmax.f32 %v1787_v8, %v1788_v0 }
 0x1e7   : > { %v1795_v23 = vrot.slane %v1794_v19, 1  ;;  %v1803_v24 = vmax.f32 %v1801_v16, %v1802_v21 }
 0x1e9   : > { %1818 = vrot.lane.b32.xlu1 %v1775_v15, %s2695_s29  ;;  %v1796_v11 = vmax.f32 %v1794_v19, %v1795_v23 }
 0x1ea   : > { %1816 = vrot.lane.b32.xlu0 %v1768_v17, %s2695_s29 }
 0x1ed   : > { %1822 = vrot.lane.b32.xlu1 %v1789_v20, %s2695_s29 }
 0x1ee   : > { %1820 = vrot.lane.b32.xlu0 %v1782_v22, %s2695_s29 }
 0x1f1   : > { %1826 = vrot.lane.b32.xlu1 %v1803_v24, %s2695_s29 }
 0x1f2   : > { %1824 = vrot.lane.b32.xlu0 %v1796_v11, %s2695_s29 }
 0x257   : > { %v1813_v25 = vpop.permute.xlu1 %1812 }
 0x258   : > { %v1815_v26 = vpop.permute.xlu0 %1814  ;;  %v1836_v32 = vmax.f32 %v1754_v2, %v1813_v25 }
 0x259   : > { %v1837_v27 = vmax.f32 %v1761_v10, %v1815_v26 }
 0x25b   : > { %v1819_v28 = vpop.permute.xlu1 %1818  ;;  %v1852_v29 = vrot.slane %v1837_v27, 7 }
 0x25c   : > { %v1817_v30 = vpop.permute.xlu0 %1816  ;;  %v1839_v33 = vmax.f32 %v1775_v15, %v1819_v28 }
 0x25d   : > { %v1838_v31 = vmax.f32 %v1768_v17, %v1817_v30  ;;  %v1854_v36 = vsel %vm1853_vm10, %v1852_v29, %v1836_v32 }
 0x25e   : > { %v1858_v40 = vrot.slane %v1839_v33, 5 }
 0x25f   : > { %v1855_v34 = vrot.slane %v1838_v31, 6  ;;  %v1823_v35 = vpop.permute.xlu1 %1822 }
 0x260   : > { %v1821_v37 = vpop.permute.xlu0 %1820  ;;  %v1841_v41 = vmax.f32 %v1789_v20, %v1823_v35 }
 0x261   : > { %v1857_v38 = vsel %vm1856_vm11, %v1855_v34, %v1854_v36  ;;  %v1840_v39 = vmax.f32 %v1782_v22, %v1821_v37 }
 0x262   : > { %v1860_v44 = vsel %vm1859_vm12, %v1858_v40, %v1857_v38  ;;  %v1864_v49 = vrot.slane %v1841_v41, 3 }
 0x263   : > { %v1861_v42 = vrot.slane %v1840_v39, 4  ;;  %v1827_v43 = vpop.permute.xlu1 %1826 }
 0x264   : > { %v1843_v45 = vmax.f32 %v1803_v24, %v1827_v43  ;;  %v1825_v46 = vpop.permute.xlu0 %1824 }
 0x265   : > { %v1863_v47 = vsel %vm1862_vm13, %v1861_v42, %v1860_v44  ;;  %v1842_v48 = vmax.f32 %v1796_v11, %v1825_v46 }
 0x266   : > { %v1870_v51 = vrot.slane %v1843_v45, 1  ;;  %v1866_v52 = vsel %vm1865_vm14, %v1864_v49, %v1863_v47 }
 0x267   : > { %v1867_v50 = vrot.slane %v1842_v48, 2 }
 0x269   : > { %v1869_v53 = vsel %vm1868_vm15, %v1867_v50, %v1866_v52 }
 0x26a   : > { %v1872_v54 = vsel %vm1871_vm0, %v1870_v51, %v1869_v53 }
 0x26b   : > { %1875 = vst.msk [vmem:[%s178_s6] sm:$0xff] %vm1874_vm1, %v1872_v54 }
 0x26c   : > { %2634 = shalt.err (!%p2631_p7)
}
 0x26d   : > { %s2635_s24 = scalar_lea.hbm %s3021_s10, 128  ;;  %s2639_s27 = scalar_lea.hbm %s3068_s3, 256 }
 0x26e   : > { %p2636_p8 = scmp.ne.s32.totalorder %s3021_s10, %s2635_s24  ;;  %p2640_p1 = scmp.lt.u32.totalorder %s3021_s10, %s3068_s3 }
 0x26f   : > { %p2641_p0 = scmp.lt.u32.totalorder %s2639_s27, %s2635_s24  ;;  %p2643_p6 = scmp.lt.u32.totalorder %s2635_s24, %s3021_s10 }
 0x270   : > { %p2637_p11 = pnand %p2636_p8, %p3079_p9 }
 0x271   : > { %p2642_p5 = por %p2641_p0, %p2640_p1 }
 0x272   : > { %p2638_p13 = pneg %p2637_p11 }
 0x273   : > { %p2644_p10 = por %p2643_p6, %p2642_p5 }
 0x275   : > { %p2645_p12 = pnand %p2644_p10, %p2638_p13 }
 0x277   : > { %2648 = shalt.err (!%p2645_p12)
}
 0x278   : > { %2436 = dma.vmem_to_hbm [thread:$0]  (%p3079_p9), %s3023_s7, 128, %s3021_s10, %s1877_s16  }
 0x279 PF: > { %p2448_p2 = scmp.ge.s32.totalorder %s2687_s15, 2  ;;  %s1902_s30 = sand.u32 1, %s2675_s12  }
 0x27a   : > { %p3080_p3 = scmp.ne.s32.totalorder %s3073_s23, 0  ;;  %s1903_s4 = scalar_lea.sflag [#allocation4], %s1902_s30 }
 0x27c   : > { %p2443_p4 = pnand %p2448_p2, %p3080_p3 }
 0x27e   : > { %2670 = dma.done.wait (!%p2443_p4), %s1903_s4, 128  }
 0x27f   : > { %2672 = vsyncadd (!%p2443_p4), %s1903_s4, 4294967168  ;;  %p14_p7 = scmp.ge.s32.totalorder %s2742_s18, 4   ;;  %s3081_s12 = smov %s2679_s13 }
 0x280   : > { %s3082_s13 = smov %s2683_s14  ;;  %s3083_s14 = smov %s2753_s21 }
 0x281   : > { %s3084_s15 = smov %s2742_s18  ;;  %16 = sbr.rel (!%p14_p7) target bundleno = 4 (0x4), region = 84 }
 0x288   :  { %1908 = vsyncpa [#allocation3], 1 }
 0x289   :  { %1910 = vsyncpa [#allocation3 + $0x1], 1 }
 0x28a   :  { %1911 = vsyncpa [#allocation4], 1 }
 0x28b   :  { %1913 = vsyncpa [#allocation4 + $0x1], 1 }

</bundles_post_ra>
